<compile_context>
chip_gen: v7x
topology: tpu7x:2x2x1
jax: 0.10.0
libtpu: 0.0.40
codegen_flags: <defaults>
</compile_context>

<pallas_src>
import functools

import jax
import jax.numpy as jnp
from jax import lax
from jax.experimental import pallas as pl
from jax.experimental.pallas import tpu as pltpu


def _round_up(x, m):
    return ((x + m - 1) // m) * m


def _choose_row_tile(N, V, dtype):
    itemsize = jnp.dtype(dtype).itemsize
    sub = 8 if itemsize >= 4 else 16          # sublane packing: f32 -> 8, bf16 -> 16
    target_bytes = 4 * 1024 * 1024            # ~4 MiB of logits per block
    rt = max(sub, (target_bytes // max(1, V * itemsize)) // sub * sub)
    rt = min(rt, 1024)                        # double-buffered blocks stay < ~8 MiB
    rt = min(rt, _round_up(max(N, 1), sub))   # never bigger than the (rounded) row count
    return max(sub, rt)


def _recon_kernel(logits_ref, tgt_ref, out_ref, sum_acc, cnt_acc, *, ignore_index):
    i = pl.program_id(1)

    @pl.when(i == 0)
    def _():
        sum_acc[...] = jnp.zeros_like(sum_acc)
        cnt_acc[...] = jnp.zeros_like(cnt_acc)

    logits = logits_ref[...].astype(jnp.float32)         # (TR, V)
    tgt = tgt_ref[...]                                    # (TR, 1) int32

    # Numerically-stable softmax pieces; reuse `shifted` for both exp and gather
    # (the row max cancels in the NLL: nll = log(sum exp(x - m)) - (x_t - m)).
    m = jnp.max(logits, axis=-1, keepdims=True)           # (TR, 1)
    shifted = logits - m                                   # (TR, V)
    sumexp = jnp.sum(jnp.exp(shifted), axis=-1, keepdims=True)  # (TR, 1)

    # Gather shifted[row, target[row]] via one-hot select (no dynamic gather on TPU).
    col_ids = lax.broadcasted_iota(jnp.int32, logits.shape, 1)  # (TR, V)
    tgt_shifted = jnp.sum(
        jnp.where(col_ids == tgt, shifted, 0.0), axis=-1, keepdims=True)  # (TR, 1)

    nll = jnp.log(sumexp) - tgt_shifted                    # (TR, 1)

    # Mask invalid rows (pad targets, padded tail rows, duplicated clamped blocks)
    # with where, so garbage logits can't inject NaN/Inf.
    valid = tgt != ignore_index                            # (TR, 1) bool
    sum_acc[...] += jnp.where(valid, nll, 0.0)
    cnt_acc[...] += valid.astype(jnp.float32)

    @pl.when(i == pl.num_programs(1) - 1)
    def _():
        s = jnp.sum(sum_acc[...])
        c = jnp.sum(cnt_acc[...])
        lane = lax.broadcasted_iota(jnp.int32, (8, 128), 1)
        # lane 0 <- per-core loss sum, lane 1 <- per-core valid count.
        out_ref[0] = jnp.where(lane == 0, s, jnp.where(lane == 1, c, 0.0))


def recon_loss_pallas(sequences, logits, pad_index, *, row_tile=None):
    """sequences: (B, T) int; logits: (B, T, V) f32/bf16. Returns scalar f32 loss."""
    B, T, V = logits.shape
    N = B * T
    dtype = logits.dtype

    # Glue (plain JAX, tiny arrays only): next-token targets, flattened.
    pad_col = jnp.full((B, 1), pad_index, dtype=jnp.int32)
    dec_targets = jnp.concatenate([sequences[:, 1:].astype(jnp.int32), pad_col], axis=1)
    targets_2d = dec_targets.reshape(N, 1)

    # logits are only reshaped (free, contiguous) -- never padded or copied in HBM.
    logits_2d = logits.reshape(N, V)

    if row_tile is None:
        row_tile = _choose_row_tile(N, V, dtype)

    num_blocks = (N + row_tile - 1) // row_tile
    num_cores = 2 if num_blocks >= 2 else 1       # shard row loop across v7x's 2 TCs
    steps_per_core = (num_blocks + num_cores - 1) // num_cores
    total_rows = num_cores * steps_per_core * row_tile

    # Pad only the tiny targets array; padded rows get ignore_index -> masked in-kernel.
    if total_rows != N:
        targets_2d = jnp.pad(targets_2d, ((0, total_rows - N), (0, 0)),
                             constant_values=pad_index)

    last_block = num_blocks - 1

    def logits_index_map(c, i):
        # Clamp so we never request a fully out-of-bounds logits block; the
        # duplicated rows are masked out via the padded targets.
        return (jnp.minimum(c * steps_per_core + i, last_block), 0)

    def targets_index_map(c, i):
        return (c * steps_per_core + i, 0)

    kernel = functools.partial(_recon_kernel, ignore_index=int(pad_index))

    itemsize = jnp.dtype(dtype).itemsize
    cost = pl.CostEstimate(
        flops=5 * N * V,
        transcendentals=N * V,
        bytes_accessed=N * V * itemsize + total_rows * 4 + num_cores * 8 * 128 * 4,
    )

    partials = pl.pallas_call(
        kernel,
        out_shape=jax.ShapeDtypeStruct((num_cores, 8, 128), jnp.float32),
        grid_spec=pltpu.PrefetchScalarGridSpec(
            num_scalar_prefetch=0,
            grid=(num_cores, steps_per_core),
            in_specs=[
                pl.BlockSpec((row_tile, V), logits_index_map),
                pl.BlockSpec((row_tile, 1), targets_index_map),
            ],
            out_specs=pl.BlockSpec((1, 8, 128), lambda c, i: (c, 0, 0)),
            scratch_shapes=[
                pltpu.VMEM((row_tile, 1), jnp.float32),  # per-row running loss sums
                pltpu.VMEM((row_tile, 1), jnp.float32),  # per-row running valid counts
            ],
        ),
        compiler_params=pltpu.CompilerParams(
            dimension_semantics=("parallel", "arbitrary"),
            vmem_limit_bytes=32 * 1024 * 1024,
        ),
        cost_estimate=cost,
    )(logits_2d, targets_2d)

    loss_sum = jnp.sum(partials[:, 0, 0])
    valid_cnt = jnp.sum(partials[:, 0, 1])
    # NOTE: division is NaN when no valid tokens exist, matching PyTorch semantics.
    return loss_sum / valid_cnt


def recon_loss_ref(sequences, logits, pad_index):
    """Pure-JAX reference matching F.cross_entropy(..., ignore_index=pad_index)."""
    B, T, V = logits.shape
    pad_col = jnp.full((B, 1), pad_index, dtype=jnp.int32)
    tgt = jnp.concatenate([sequences[:, 1:].astype(jnp.int32), pad_col], axis=1).reshape(-1)
    lg = logits.reshape(-1, V).astype(jnp.float32)
    lse = jax.scipy.special.logsumexp(lg, axis=-1)
    tgt_logit = jnp.take_along_axis(lg, tgt[:, None], axis=-1)[:, 0]
    valid = (tgt != pad_index).astype(jnp.float32)
    return jnp.sum((lse - tgt_logit) * valid) / jnp.sum(valid)


if __name__ == "__main__":
    key = jax.random.PRNGKey(0)
    k1, k2, k3, k4 = jax.random.split(key, 4)
    pad_index = 0

    # --- Test 1: f32 logits, auto row tile (single block). ---
    B, T, V = 2, 8, 32
    sequences = jax.random.randint(k1, (B, T), 0, V, dtype=jnp.int32)
    sequences = sequences.at[:, -2:].set(pad_index)          # trailing padding
    logits = jax.random.normal(k2, (B, T, V), dtype=jnp.float32)

    loss = jax.block_until_ready(recon_loss_pallas(sequences, logits, pad_index))
    ref = recon_loss_ref(sequences, logits, pad_index)
    assert jnp.allclose(loss, ref, rtol=1e-5, atol=1e-5), (loss, ref)

    # --- Test 2: f32 logits, forced small tile -> multi-block, 2-core parallel
    #             axis, ragged row count (exercises clamping + in-kernel masking). ---
    B2, T2 = 2, 10                                            # N = 20, not a tile multiple
    sequences2 = jax.random.randint(k3, (B2, T2), 0, V, dtype=jnp.int32)
    sequences2 = sequences2.at[:, -3:].set(pad_index)
    logits2 = jax.random.normal(k4, (B2, T2, V), dtype=jnp.float32)

    loss2 = jax.block_until_ready(recon_loss_pallas(sequences2, logits2, pad_index,
                                                    row_tile=8))
    ref2 = recon_loss_ref(sequences2, logits2, pad_index)
    assert jnp.allclose(loss2, ref2, rtol=1e-5, atol=1e-5), (loss2, ref2)

    # --- Test 3: bf16 logits (halves HBM traffic), row_tile multiple of 16. ---
    logits_bf16 = logits.astype(jnp.bfloat16)
    loss3 = jax.block_until_ready(recon_loss_pallas(sequences, logits_bf16, pad_index,
                                                    row_tile=16))
    ref3 = recon_loss_ref(sequences, logits_bf16, pad_index)  # ref upcasts to f32 too
    assert jnp.allclose(loss3, ref3, rtol=1e-5, atol=1e-5), (loss3, ref3)

    print("KERNEL_OK")
</pallas_src>

<mosaic_0001>
module attributes {stable_mosaic.version = 11 : i64} {
  func.func @_recon_kernel(%arg0: i32, %arg1: i32, %arg2: memref<16x32xf32, #tpu.memory_space<vmem>>, %arg3: memref<16x1xi32, #tpu.memory_space<vmem>>, %arg4: memref<1x8x128xf32, #tpu.memory_space<vmem>>, %arg5: memref<16x1xf32, #tpu.memory_space<vmem>>, %arg6: memref<16x1xf32, #tpu.memory_space<vmem>>) attributes {dimension_semantics = [#tpu.dimension_semantics<parallel>, #tpu.dimension_semantics<arbitrary>], iteration_bounds = array<i64: 1, 1>, scalar_prefetch = 0 : i64, scratch_operands = 2 : i64, tpu.core_type = #tpu.core_type<tc>, window_params = [{transform_indices = @transform_0, window_bounds = array<i64: 16, 32>}, {transform_indices = @transform_1, window_bounds = array<i64: 16, 1>}, {transform_indices = @transform_2, window_bounds = array<i64: 1, 8, 128>}]} {
    %c0_i32 = arith.constant 0 : i32
    %0 = arith.cmpi eq, %arg1, %c0_i32 : i32
    %1 = arith.extui %0 : i1 to i32
    %c0_i32_0 = arith.constant 0 : i32
    %2 = arith.cmpi ne, %1, %c0_i32_0 : i32
    scf.if %2 {
      %cst_19 = arith.constant 0.000000e+00 : f32
      %36 = vector.broadcast %cst_19 : f32 to vector<16x1xf32>
      %c0_20 = arith.constant 0 : index
      %c0_21 = arith.constant 0 : index
      %37 = vector.load %arg5[%c0_20, %c0_21] : memref<16x1xf32, #tpu.memory_space<vmem>>, vector<16x1xf32>
      tpu.vector_store %arg5[%c0_20, %c0_21], %36 {strides = array<i32>} : memref<16x1xf32, #tpu.memory_space<vmem>>, vector<16x1xf32>,
      %cst_22 = arith.constant 0.000000e+00 : f32
      %38 = vector.broadcast %cst_22 : f32 to vector<16x1xf32>
      %c0_23 = arith.constant 0 : index
      %c0_24 = arith.constant 0 : index
      %39 = vector.load %arg6[%c0_23, %c0_24] : memref<16x1xf32, #tpu.memory_space<vmem>>, vector<16x1xf32>
      tpu.vector_store %arg6[%c0_23, %c0_24], %38 {strides = array<i32>} : memref<16x1xf32, #tpu.memory_space<vmem>>, vector<16x1xf32>,
    } else {
    }
    %c0 = arith.constant 0 : index
    %c0_1 = arith.constant 0 : index
    %3 = vector.load %arg2[%c0, %c0_1] : memref<16x32xf32, #tpu.memory_space<vmem>>, vector<16x32xf32>
    %c0_2 = arith.constant 0 : index
    %c0_3 = arith.constant 0 : index
    %4 = vector.load %arg3[%c0_2, %c0_3] : memref<16x1xi32, #tpu.memory_space<vmem>>, vector<16x1xi32>
    %cst = arith.constant dense<0xFF800000> : vector<16xf32>
    %5 = vector.multi_reduction <maximumf>, %3, %cst [1] : vector<16x32xf32> to vector<16xf32>
    %6 = vector.shape_cast %5 : vector<16xf32> to vector<16x1xf32>
    %7 = vector.broadcast %6 : vector<16x1xf32> to vector<16x32xf32>
    %8 = arith.subf %3, %7 : vector<16x32xf32>
    %9 = math.exp %8 : vector<16x32xf32>
    %cst_4 = arith.constant dense<0.000000e+00> : vector<16xf32>
    %10 = vector.multi_reduction <add>, %9, %cst_4 [1] : vector<16x32xf32> to vector<16xf32>
    %11 = vector.shape_cast %10 : vector<16xf32> to vector<16x1xf32>
    %12 = tpu.iota {dimensions = array<i32: 1>} : vector<16x32xi32>
    %13 = vector.broadcast %4 : vector<16x1xi32> to vector<16x32xi32>
    %14 = arith.cmpi eq, %12, %13 : vector<16x32xi32>
    %cst_5 = arith.constant 0.000000e+00 : f32
    %15 = vector.broadcast %cst_5 : f32 to vector<16x32xf32>
    %16 = arith.select %14, %8, %15 : vector<16x32xi1>, vector<16x32xf32>
    %cst_6 = arith.constant dense<0.000000e+00> : vector<16xf32>
    %17 = vector.multi_reduction <add>, %16, %cst_6 [1] : vector<16x32xf32> to vector<16xf32>
    %18 = vector.shape_cast %17 : vector<16xf32> to vector<16x1xf32>
    %19 = math.log %11 : vector<16x1xf32>
    %20 = arith.subf %19, %18 : vector<16x1xf32>
    %c0_i32_7 = arith.constant 0 : i32
    %21 = vector.broadcast %c0_i32_7 : i32 to vector<16x1xi32>
    %22 = arith.cmpi ne, %4, %21 : vector<16x1xi32>
    %c0_8 = arith.constant 0 : index
    %c0_9 = arith.constant 0 : index
    %23 = vector.load %arg5[%c0_8, %c0_9] : memref<16x1xf32, #tpu.memory_space<vmem>>, vector<16x1xf32>
    %cst_10 = arith.constant 0.000000e+00 : f32
    %24 = vector.broadcast %cst_10 : f32 to vector<16x1xf32>
    %25 = arith.select %22, %20, %24 : vector<16x1xi1>, vector<16x1xf32>
    %26 = arith.addf %23, %25 : vector<16x1xf32>
    %c0_11 = arith.constant 0 : index
    %c0_12 = arith.constant 0 : index
    %27 = vector.load %arg5[%c0_11, %c0_12] : memref<16x1xf32, #tpu.memory_space<vmem>>, vector<16x1xf32>
    tpu.vector_store %arg5[%c0_11, %c0_12], %26 {strides = array<i32>} : memref<16x1xf32, #tpu.memory_space<vmem>>, vector<16x1xf32>,
    %c0_13 = arith.constant 0 : index
    %c0_14 = arith.constant 0 : index
    %28 = vector.load %arg6[%c0_13, %c0_14] : memref<16x1xf32, #tpu.memory_space<vmem>>, vector<16x1xf32>
    %29 = arith.extui %22 : vector<16x1xi1> to vector<16x1xi32>
    %30 = arith.sitofp %29 : vector<16x1xi32> to vector<16x1xf32>
    %31 = arith.addf %28, %30 : vector<16x1xf32>
    %c0_15 = arith.constant 0 : index
    %c0_16 = arith.constant 0 : index
    %32 = vector.load %arg6[%c0_15, %c0_16] : memref<16x1xf32, #tpu.memory_space<vmem>>, vector<16x1xf32>
    tpu.vector_store %arg6[%c0_15, %c0_16], %31 {strides = array<i32>} : memref<16x1xf32, #tpu.memory_space<vmem>>, vector<16x1xf32>,
    %c0_i32_17 = arith.constant 0 : i32
    %33 = arith.cmpi eq, %arg1, %c0_i32_17 : i32
    %34 = arith.extui %33 : i1 to i32
    %c0_i32_18 = arith.constant 0 : i32
    %35 = arith.cmpi ne, %34, %c0_i32_18 : i32
    scf.if %35 {
      %c0_19 = arith.constant 0 : index
      %c0_20 = arith.constant 0 : index
      %36 = vector.load %arg5[%c0_19, %c0_20] : memref<16x1xf32, #tpu.memory_space<vmem>>, vector<16x1xf32>
      %37 = vector.shape_cast %36 : vector<16x1xf32> to vector<1x16x1xf32>
      %cst_21 = arith.constant dense<0.000000e+00> : vector<1xf32>
      %38 = vector.multi_reduction <add>, %37, %cst_21 [1, 2] : vector<1x16x1xf32> to vector<1xf32>
      %39 = vector.shape_cast %38 : vector<1xf32> to vector<1x1x1xf32>
      %40 = vector.extract %39[0, 0, 0] : f32 from vector<1x1x1xf32>
      %c0_22 = arith.constant 0 : index
      %c0_23 = arith.constant 0 : index
      %41 = vector.load %arg6[%c0_22, %c0_23] : memref<16x1xf32, #tpu.memory_space<vmem>>, vector<16x1xf32>
      %42 = vector.shape_cast %41 : vector<16x1xf32> to vector<1x16x1xf32>
      %cst_24 = arith.constant dense<0.000000e+00> : vector<1xf32>
      %43 = vector.multi_reduction <add>, %42, %cst_24 [1, 2] : vector<1x16x1xf32> to vector<1xf32>
      %44 = vector.shape_cast %43 : vector<1xf32> to vector<1x1x1xf32>
      %45 = vector.extract %44[0, 0, 0] : f32 from vector<1x1x1xf32>
      %46 = tpu.iota {dimensions = array<i32: 1>} : vector<8x128xi32>
      %c0_i32_25 = arith.constant 0 : i32
      %47 = vector.broadcast %c0_i32_25 : i32 to vector<8x128xi32>
      %48 = arith.cmpi eq, %46, %47 : vector<8x128xi32>
      %c1_i32 = arith.constant 1 : i32
      %49 = vector.broadcast %c1_i32 : i32 to vector<8x128xi32>
      %50 = arith.cmpi eq, %46, %49 : vector<8x128xi32>
      %cst_26 = arith.constant 0.000000e+00 : f32
      %51 = vector.broadcast %45 : f32 to vector<8x128xf32>
      %52 = vector.broadcast %cst_26 : f32 to vector<8x128xf32>
      %53 = arith.select %50, %51, %52 : vector<8x128xi1>, vector<8x128xf32>
      %54 = vector.broadcast %40 : f32 to vector<8x128xf32>
      %55 = arith.select %48, %54, %53 : vector<8x128xi1>, vector<8x128xf32>
      %c0_27 = arith.constant 0 : index
      %c0_28 = arith.constant 0 : index
      %c0_29 = arith.constant 0 : index
      %56 = vector.load %arg4[%c0_27, %c0_28, %c0_29] : memref<1x8x128xf32, #tpu.memory_space<vmem>>, vector<1x8x128xf32>
      %57 = vector.shape_cast %56 : vector<1x8x128xf32> to vector<8x128xf32>
      %58 = vector.shape_cast %55 : vector<8x128xf32> to vector<1x8x128xf32>
      tpu.vector_store %arg4[%c0_27, %c0_28, %c0_29], %58 {strides = array<i32>} : memref<1x8x128xf32, #tpu.memory_space<vmem>>, vector<1x8x128xf32>,
    } else {
    }
    return
  }
  func.func @transform_0(%arg0: i32, %arg1: i32) -> (i32, i32) {
    %c1_i32 = arith.constant 1 : i32
    %0 = arith.muli %arg0, %c1_i32 : i32
    %1 = arith.addi %0, %arg1 : i32
    %c0_i32 = arith.constant 0 : i32
    %2 = arith.minsi %1, %c0_i32 : i32
    %c0_i32_0 = arith.constant 0 : i32
    %c0_i32_1 = arith.constant 0 : i32
    return %2, %c0_i32_0 : i32, i32
  }
  func.func @transform_1(%arg0: i32, %arg1: i32) -> (i32, i32) {
    %c1_i32 = arith.constant 1 : i32
    %0 = arith.muli %arg0, %c1_i32 : i32
    %1 = arith.addi %0, %arg1 : i32
    %c0_i32 = arith.constant 0 : i32
    %c0_i32_0 = arith.constant 0 : i32
    return %1, %c0_i32 : i32, i32
  }
  func.func @transform_2(%arg0: i32, %arg1: i32) -> (i32, i32, i32) {
    %c0_i32 = arith.constant 0 : i32
    %c0_i32_0 = arith.constant 0 : i32
    %c0_i32_1 = arith.constant 0 : i32
    return %arg0, %c0_i32, %c0_i32_0 : i32, i32, i32
  }
}

</mosaic_0001>

<bundles_post_ra>
// kernel: tpu_custom_call.1
= control target key start
LH: loop header
LB: loop body
LE: loop exit
PB: predicated region body
PF: predicated region fallthrough
CT: control target
= control target key end

     0   :  { %vm79_vm0 = vcmask 261120   ;;  %vm70_vm1 = vcmask 7168   ;;  %v250_v4 = vmov 0   ;;  %v251_v5 = vmov 0.0   ;;  %s326_s0 = inlined_call_operand.vmem [shape: f32[16,32], index: 0, kind: input, shape index: {}]   ;;  %s327_s1 = inlined_call_operand.vmem [shape: s32[16,1], index: 1, kind: input, shape index: {}]   ;;  %s328_s2 = inlined_call_operand.hbm [shape: f32[1,8,128], index: 2, kind: output, shape index: {}]  }
   0x1   :  { %v75_v0 = vld [vmem:[%s326_s0] sm:$0xff]  ;;  %v76_v1 = vld [vmem:[%s326_s0 + $0x8] sm:$0xff]  ;;  %216 = vset.pattern.permute.xlu1 %v250_v4  ;;  %217 = vset.pattern.permute.xlu0 %v250_v4  ;;  %73 = vst.msk [vmem:[#allocation3] sm:$0xff] %vm70_vm1, %v251_v5  ;;  %71 = vst.msk [vmem:[#allocation2] sm:$0xff] %vm70_vm1, %v251_v5 }
   0x2   :  { %v277_v2 = vld [vmem:[%s327_s1] sm:$0xff]  ;;  %v80_v3 = vsel %vm79_vm0, %v75_v0, -inf  ;;  %72 = vst.msk [vmem:[#allocation2 + $0x8] sm:$0xff] %vm70_vm1, %v251_v5  ;;  %74 = vst.msk [vmem:[#allocation3 + $0x8] sm:$0xff] %vm70_vm1, %v251_v5 }
   0x3   :  { %81 = vmax.xlane.f32.xlu0 %v80_v3  ;;  %101 = vperm.xlu1 %216, %v277_v2  }
   0x4   :  { %7 = vsyncpa [#allocation5], 0  ;;  %v83_v6 = vsel %vm79_vm0, %v76_v1, -inf  ;;  %v78_v7 = vld [vmem:[%s327_s1 + $0x8] sm:$0xff]  ;;  %vm122_vm2 = vcmp.ne.s32.totalorder %v277_v2, 0  ;;  %v98_v19 = vlaneseq  ;;  %s252_s16 = smov [#allocation4]  }
   0x5   :  { %vm123_vm3 = vcmp.ne.s32.totalorder %v78_v7, 0  ;;  %v207_v8 = vsel %vm122_vm2, 1.0, %v251_v5  ;;  %s187_s17 = sshll.u32 %s252_s16, 4  ;;  %s188_s17 = int_to_ptr.vmem [resolvable:$true] %s187_s17 }
   0x6   :  { %v208_v9 = vsel %vm123_vm3, 1.0, %v251_v5  ;;  %v295_v22 = vand.u32 127, %v98_v19  ;;  %s226_s19 = scalar_lea.vmem %s188_s17, 128  ;;  %p231_p1 = scmp.lt.s32.totalorder %s188_s17, %s188_s17 }
   0x7   :  { %84 = vmax.xlane.f32.xlu0 %v83_v6  ;;  %104 = vperm.xlu1 %216, %v78_v7   ;;  %p227_p0 = scmp.ne.s32.totalorder %s188_s17, %s226_s19  ;;  %p232_p2 = scmp.lt.s32.totalorder %s226_s19, %s226_s19 }
   0x8   :  { %v133_v10 = vld [vmem:[#allocation3] sm:$0xff]  ;;  %v124_v38 = vld [vmem:[#allocation2] sm:$0xff]  ;;  %vm175_vm6 = vcmp.eq.s32.totalorder %v295_v22, 1  ;;  %vm174_vm7 = vcmp.eq.s32.totalorder %v295_v22, 0 }
   0x9   :  { %v134_v11 = vld [vmem:[#allocation3 + $0x8] sm:$0xff]  ;;  %v139_v12 = vadd.f32 %v207_v8, %v133_v10  ;;  %v125_v45 = vld [vmem:[#allocation2 + $0x8] sm:$0xff]  ;;  %p233_p3 = por %p232_p2, %p231_p1 }
   0xa   :  { %v140_v13 = vadd.f32 %v208_v9, %v134_v11 }
   0xb   :  { %141 = vst.msk [vmem:[#allocation3] sm:$0xff] %vm70_vm1, %v139_v12  ;;  %p234_p4 = pnand %p233_p3, %p227_p0 }
   0xc   :  { %142 = vst.msk [vmem:[#allocation3 + $0x8] sm:$0xff] %vm70_vm1, %v140_v13 }
  0x12   :  { %v160_v49 = vld [vmem:[#allocation3] sm:$0xff] }
  0x13   :  { %v161_v50 = vld [vmem:[#allocation3 + $0x8] sm:$0xff]  ;;  %v162_v54 = vsel %vm70_vm1, %v160_v49, 0.0 }
  0x14   :  { %v163_v55 = vsel %vm70_vm1, %v161_v50, 0.0 }
  0x15   :  { %v164_v57 = vadd.f32 %v163_v55, %v162_v54 }
  0x82   :  { %v102_v21 = vpop.permute.xlu1 %101 }
  0x83   :  { %vm106_vm4 = vcmp.eq.s32.totalorder %v295_v22, %v102_v21 }
  0x86   :  { %v105_v24 = vpop.permute.xlu1 %104 }
  0x87   :  { %vm107_vm5 = vcmp.eq.s32.totalorder %v295_v22, %v105_v24 }
  0x90   :  { %v82_v14 = vpop.xlane.xlu0 %81 }
  0x91   :  { %v86_v15 = vsub.f32 %v75_v0, %v82_v14 }
  0x93   :  { %v88_v16 = vmul.f32 1.442695, %v86_v15  ;;  %v108_v26 = vsel %vm106_vm4, %v86_v15, 0.0 }
  0x94   :  { %v85_v17 = vpop.xlane.xlu0 %84  ;;  %v110_v28 = vsel %vm79_vm0, %v108_v26, 0.0 }
  0x95   :  { %218 = vpow2.f32 %v88_v16  ;;  %v87_v18 = vsub.f32 %v76_v1, %v85_v17 }
  0x97   :  { %v90_v20 = vmul.f32 1.442695, %v87_v18  ;;  %v109_v30 = vsel %vm107_vm5, %v87_v18, 0.0 }
  0x98   :  { %v113_v31 = vsel %vm79_vm0, %v109_v30, 0.0 }
  0x99   :  { %220 = vpow2.f32 %v90_v20 }
  0x9f   :  { %v219_v23 = vpop.eup %218 }
  0xa0   :  { %v92_v25 = vsel %vm79_vm0, %v219_v23, 0.0 }
  0xa1   :  { %93 = vadd.xlane.f32.xlu0 %v92_v25 }
  0xa3   :  { %v221_v27 = vpop.eup %220 }
  0xa4   :  { %v95_v29 = vsel %vm79_vm0, %v221_v27, 0.0 }
  0xa5   :  { %111 = vadd.xlane.f32.xlu0 %v110_v28  ;;  %96 = vadd.xlane.f32.xlu1 %v95_v29 }
  0xa9   :  { %114 = vadd.xlane.f32.xlu0 %v113_v31 }
 0x12e   :  { %v94_v32 = vpop.xlane.xlu0 %93 }
 0x12f   :  { %222 = vlog2.f32 %v94_v32 }
 0x132   :  { %v97_v33 = vpop.xlane.xlu1 %96  ;;  %v112_v35 = vpop.xlane.xlu0 %111 }
 0x133   :  { %224 = vlog2.f32 %v97_v33 }
 0x136   :  { %v115_v43 = vpop.xlane.xlu0 %114 }
 0x139   :  { %v223_v34 = vpop.eup %222 }
 0x13a   :  { %v117_v36 = vmul.f32 0.6931472, %v223_v34 }
 0x13c   :  { %v120_v37 = vsub.f32 %v117_v36, %v112_v35 }
 0x13d   :  { %v225_v39 = vpop.eup %224 }
 0x13e   :  { %v126_v40 = vsel %vm122_vm2, %v120_v37, 0.0  ;;  %v119_v41 = vmul.f32 0.6931472, %v225_v39 }
 0x13f   :  { %v128_v42 = vadd.f32 %v126_v40, %v124_v38 }
 0x140   :  { %v121_v44 = vsub.f32 %v119_v41, %v115_v43 }
 0x141   :  { %131 = vst.msk [vmem:[#allocation2] sm:$0xff] %vm70_vm1, %v128_v42 }
 0x142   :  { %v127_v46 = vsel %vm123_vm3, %v121_v44, 0.0 }
 0x143   :  { %v129_v47 = vadd.f32 %v127_v46, %v125_v45 }
 0x145   :  { %132 = vst.msk [vmem:[#allocation2 + $0x8] sm:$0xff] %vm70_vm1, %v129_v47 }
 0x148   :  { %v146_v48 = vld [vmem:[#allocation2] sm:$0xff] }
 0x149   :  { %v148_v52 = vsel %vm70_vm1, %v146_v48, 0.0 }
 0x14c   :  { %v147_v51 = vld [vmem:[#allocation2 + $0x8] sm:$0xff] }
 0x14d   :  { %v149_v53 = vsel %vm70_vm1, %v147_v51, 0.0 }
 0x14e   :  { %v150_v56 = vadd.f32 %v149_v53, %v148_v52 }
 0x150   :  { %151 = vadd.xlane.f32.xlu0 %v150_v56 }
 0x154   :  { %165 = vadd.xlane.f32.xlu0 %v164_v57 }
 0x1dd   :  { %v152_v58 = vpop.xlane.xlu0 %151 }
 0x1de   :  { %v153_v59 = vrot.slane %v152_v58, 4 }
 0x1e0   :  { %v154_v60 = vadd.f32 %v153_v59, %v152_v58 }
 0x1e1   :  { %v166_v61 = vpop.xlane.xlu0 %165 }
 0x1e2   :  { %v155_v62 = vrot.slane %v154_v60, 2  ;;  %v167_v63 = vrot.slane %v166_v61, 4 }
 0x1e4   :  { %v168_v0 = vadd.f32 %v167_v63, %v166_v61  ;;  %v156_v1 = vadd.f32 %v155_v62, %v154_v60 }
 0x1e6   :  { %v169_v2 = vrot.slane %v168_v0, 2  ;;  %v157_v3 = vrot.slane %v156_v1, 1 }
 0x1e8   :  { %v170_v4 = vadd.f32 %v169_v2, %v168_v0  ;;  %v158_v5 = vadd.f32 %v157_v3, %v156_v1 }
 0x1ea   :  { %209 = vpush %v158_v5  ;;  %v171_v6 = vrot.slane %v170_v4, 1 }
 0x1ec   :  { %v172_v7 = vadd.f32 %v171_v6, %v170_v4 }
 0x1ee   :  { %211 = vpush %v172_v7 }
 0x21b   :  { %s210_s1 = spop %209 }
 0x21c   :  { %v178_v9 = vstv %s210_s1 }
 0x21f   :  { %s212_s18 = spop %211 }
 0x220   :  { %v176_v8 = vstv %s212_s18 }
 0x221   :  { %v177_v10 = vsel %vm175_vm6, %v176_v8, 0.0 }
 0x222   :  { %v179_v11 = vsel %vm174_vm7, %v178_v9, %v177_v10 }
 0x223   :  { %180 = vst [vmem:[#allocation4] sm:$0xff] %v179_v11 }
 0x224   :  { %237 = shalt.err (!%p234_p4)
}
 0x225   :  { %s238_s22 = scalar_lea.hbm %s328_s2, 128 }
 0x226   :  { %p239_p5 = scmp.ne.s32.totalorder %s328_s2, %s238_s22  ;;  %p242_p6 = scmp.lt.u32.totalorder %s238_s22, %s328_s2 }
 0x228   :  { %p244_p7 = pnand %p242_p6, %p239_p5 }
 0x22a   :  { %247 = shalt.err (!%p244_p7)
}
 0x22b   :  { %190 = dma.vmem_to_hbm [thread:$0]  %s188_s17, 128, %s328_s2, [#allocation5]  }
 0x22c   :  { %248 = dma.done.wait [#allocation5], 128  }
 0x22d   :  { %249 = vsyncadd [#allocation5], 4294967168 }
 0x22e   :  { %194 = vsyncpa [#allocation5], 1 }

</bundles_post_ra>
